<compile_context>
chip_gen: v7x
topology: tpu7x:2x2x1
jax: 0.10.0
libtpu: 0.0.40
codegen_flags: <defaults>
</compile_context>

<pallas_src>
import jax
import jax.numpy as jnp
from jax.experimental import pallas as pl
from jax.experimental.pallas import tpu as pltpu


def esmm_kernel(x_ref, w1_ref, w2_ref, wot_ref, b1_ref, b2_ref, bot_ref, out_ref):
    """Fused two-tower MLP + sigmoid + ctcvr for one batch tile; writes (3, TB)."""
    # Cast in-kernel (no standalone HBM cast pass over x in the wrapper).
    x = x_ref[...].astype(w1_ref.dtype)                               # (TB, D) bf16

    # Fused layer 1: both towers' first layers share x.
    h = jnp.dot(x, w1_ref[...], preferred_element_type=jnp.float32)   # (TB, H1) f32
    h = jnp.maximum(h + b1_ref[...], 0.0)                             # ReLU (eval dropout = id)

    # Fused layer 2: block-diagonal weight keeps the towers independent.
    h = jnp.dot(h.astype(w2_ref.dtype), w2_ref[...],
                preferred_element_type=jnp.float32)                   # (TB, H2) f32
    h = jnp.maximum(h + b2_ref[...], 0.0)

    # Fused heads, computed transposed so the result is lane-dense:
    #   (2, H2) contracted with (TB, H2) on the last dim  ->  (2, TB)
    logits_t = jax.lax.dot_general(
        wot_ref[...], h.astype(wot_ref.dtype),
        dimension_numbers=(((1,), (1,)), ((), ())),
        preferred_element_type=jnp.float32)                           # (2, TB) f32
    logits_t = logits_t + bot_ref[...]                                # + (2, 1) bias

    # sigmoid: exp rides the EUP; formulation is inf-safe for pad rows of edge tiles.
    preds = pl.reciprocal(1.0 + jnp.exp(-logits_t), approx=False)     # (2, TB) f32
    cvr = preds[0:1, :]
    ctr = preds[1:2, :]
    out_ref[...] = jnp.concatenate([cvr, ctr, cvr * ctr], axis=0)     # (3, TB) f32


def prepare_esmm_params(cvr_params, ctr_params, compute_dtype=jnp.bfloat16):
    """One-time fusion of the two tower MLPs into kernel-ready weights.

    Each *_params is [W1, b1, W2, b2, Wo, bo] with W as (in, out), b as (1, out),
    eval-mode BatchNorm already folded into W/b.  (Towers: 2 hidden layers + 1 head.)
    """
    w1c, b1c, w2c, b2c, woc, boc = cvr_params
    w1t, b1t, w2t, b2t, wot, bot = ctr_params
    h1c, h2c = w1c.shape[1], w2c.shape[1]
    h1t, h2t = w1t.shape[1], w2t.shape[1]
    h1, h2 = h1c + h1t, h2c + h2t

    w1 = jnp.concatenate([w1c, w1t], axis=1)                          # (D, h1)
    w2 = jnp.zeros((h1, h2), jnp.float32)
    w2 = w2.at[:h1c, :h2c].set(w2c).at[h1c:, h2c:].set(w2t)           # block-diagonal
    wo_t = jnp.zeros((2, h2), jnp.float32)                            # heads, transposed
    wo_t = wo_t.at[0, :h2c].set(woc[:, 0]).at[1, h2c:].set(wot[:, 0])

    b1 = jnp.concatenate([b1c, b1t], axis=1)                          # (1, h1) f32
    b2 = jnp.concatenate([b2c, b2t], axis=1)                          # (1, h2) f32
    bo_t = jnp.concatenate([boc, bot], axis=1).reshape(2, 1)          # (2, 1)  f32

    return (w1.astype(compute_dtype), w2.astype(compute_dtype),
            wo_t.astype(compute_dtype), b1, b2, bo_t)


def _pick_batch_tile(batch, block_b):
    """Batch tile: big (amortize per-step overhead), multiple of 128 (lane-dense
    (3, tb) output + bf16 sublanes), and >= 2 grid steps when possible (v7x)."""
    tb = min(block_b, batch)
    if tb < batch:
        tb = max(128, (tb // 128) * 128)
    elif batch >= 256:
        tb = max(128, (batch // 2 // 128) * 128)    # keep both v7x TCs busy
    return tb


def esmm_forward(input_tower, fused_params, *, block_b=2048):
    """ESMM forward on TPU.

    input_tower: (B, D) float array (any float dtype; cast in-kernel).
    fused_params: output of prepare_esmm_params.
    Returns (B, 3) f32 = [cvr, ctr, ctcvr].
    """
    B, D = input_tower.shape
    w1, w2, wo_t, b1, b2, bo_t = fused_params
    h1, h2 = w1.shape[1], w2.shape[1]

    tb = _pick_batch_tile(B, block_b)
    grid = (pl.cdiv(B, tb),)

    def const(shape):   # weights/biases: fetched once, VMEM-resident across steps
        return pl.BlockSpec(shape, lambda i: (0,) * len(shape))

    out_t = pl.pallas_call(
        esmm_kernel,
        out_shape=jax.ShapeDtypeStruct((3, B), jnp.float32),
        grid=grid,
        in_specs=[
            pl.BlockSpec((tb, D), lambda i: (i, 0)),   # x: batch-tiled
            const((D, h1)),                            # fused W1
            const((h1, h2)),                           # block-diagonal W2
            const((2, h2)),                            # fused heads (transposed)
            const((1, h1)),                            # b1
            const((1, h2)),                            # b2
            const((2, 1)),                             # head bias (transposed)
        ],
        out_specs=pl.BlockSpec((3, tb), lambda i: (0, i)),  # lane-dense (3, B) output
        compiler_params=pltpu.CompilerParams(
            dimension_semantics=("parallel",),         # shard batch tiles across TCs
        ),
    )(input_tower, w1, w2, wo_t, b1, b2, bo_t)

    return out_t.T    # (B, 3): [cvr, ctr, ctcvr]


def make_tower_params(key, dims):
    """Linear + folded eval-mode BatchNorm params for an MLP tower.

    dims: [in_dim, h1, h2, 1]; BN folded for every hidden layer.
    Returns [W1, b1, W2, b2, Wout, bout] with W as (in, out), b as (1, out), f32.
    """
    params = []
    n_layers = len(dims) - 1
    for li in range(n_layers):
        fan_in, fan_out = dims[li], dims[li + 1]
        key, k_w, k_b, k_g, k_be, k_m, k_v = jax.random.split(key, 7)
        w = jax.random.normal(k_w, (fan_in, fan_out), jnp.float32) * 0.1
        b = jax.random.normal(k_b, (1, fan_out), jnp.float32) * 0.1
        if li < n_layers - 1:
            # eval BatchNorm1d: y = (z - rmean)/sqrt(rvar+eps)*gamma + beta -> fold into W,b
            gamma = 1.0 + 0.1 * jax.random.normal(k_g, (fan_out,), jnp.float32)
            beta = 0.1 * jax.random.normal(k_be, (fan_out,), jnp.float32)
            rmean = 0.1 * jax.random.normal(k_m, (fan_out,), jnp.float32)
            rvar = 1.0 + 0.1 * jax.random.uniform(k_v, (fan_out,), jnp.float32)
            scale = gamma / jnp.sqrt(rvar + 1e-5)
            shift = beta - rmean * scale
            w = w * scale[None, :]
            b = b * scale[None, :] + shift[None, :]
        params.extend([w, b])
    return params


def reference_forward(x, params):
    """Plain-JAX f32 reference of one tower stack (Linear/BN-folded/ReLU x2 + head)."""
    w1, b1, w2, b2, wo, bo = params
    h = jnp.maximum(x @ w1 + b1, 0.0)
    h = jnp.maximum(h @ w2 + b2, 0.0)
    return h @ wo + bo


if __name__ == "__main__":
    key = jax.random.PRNGKey(0)

    # --- synthetic feature config (small) ---------------------------------
    B = 320              # exercises 3 pipelined grid steps incl. a partial edge tile
    n_user_feats = 2     # sparse user features
    n_item_feats = 2     # sparse item features
    embed_dim = 16
    vocab = 100
    tower_dims = (n_user_feats + n_item_feats) * embed_dim   # 64

    # --- embedding tables + sparse id inputs (lookup = glue, plain JAX) ----
    # TODO(synk): the data-dependent embedding gather stays in plain JAX.
    key, k_tab_u, k_tab_i, k_id_u, k_id_i = jax.random.split(key, 5)
    user_tables = jax.random.normal(k_tab_u, (n_user_feats, vocab, embed_dim), jnp.float32) * 0.1
    item_tables = jax.random.normal(k_tab_i, (n_item_feats, vocab, embed_dim), jnp.float32) * 0.1
    user_ids = jax.random.randint(k_id_u, (B, n_user_feats), 0, vocab)
    item_ids = jax.random.randint(k_id_i, (B, n_item_feats), 0, vocab)

    embed_user = jnp.stack(
        [user_tables[f][user_ids[:, f]] for f in range(n_user_feats)], axis=1
    ).reshape(B, -1)
    embed_item = jnp.stack(
        [item_tables[f][item_ids[:, f]] for f in range(n_item_feats)], axis=1
    ).reshape(B, -1)
    input_tower_f32 = jnp.concatenate([embed_user, embed_item], axis=1)   # (B, 64)
    # bf16 cast fused into the upstream embedding glue (no standalone HBM cast pass).
    input_tower = input_tower_f32.astype(jnp.bfloat16)

    # --- tower params (cvr dims [32,16], ctr dims [32,16]) -----------------
    key, k_cvr, k_ctr = jax.random.split(key, 3)
    cvr_p = make_tower_params(k_cvr, [tower_dims, 32, 16, 1])
    ctr_p = make_tower_params(k_ctr, [tower_dims, 32, 16, 1])
    fused = prepare_esmm_params(cvr_p, ctr_p)     # one-time weight fusion / bf16 cast

    # --- run Pallas kernel --------------------------------------------------
    out = esmm_forward(input_tower, fused, block_b=2048)
    out = jax.block_until_ready(out)

    # --- verify against plain-JAX f32 reference -----------------------------
    # bf16 matmul operands => loosened tolerance.
    cvr_ref = jax.nn.sigmoid(reference_forward(input_tower_f32, cvr_p))
    ctr_ref = jax.nn.sigmoid(reference_forward(input_tower_f32, ctr_p))
    ref = jnp.concatenate([cvr_ref, ctr_ref, ctr_ref * cvr_ref], axis=1)
    assert out.shape == (B, 3)
    err = jnp.max(jnp.abs(out - ref))
    assert jnp.allclose(out, ref, atol=2e-2, rtol=2e-2), f"max abs err {err}"

    print("KERNEL_OK")
</pallas_src>

<mosaic_0001>
module attributes {stable_mosaic.version = 11 : i64} {
  func.func @esmm_kernel(%arg0: i32, %arg1: memref<128x64xbf16, #tpu.memory_space<vmem>>, %arg2: memref<64x64xbf16, #tpu.memory_space<vmem>>, %arg3: memref<64x32xbf16, #tpu.memory_space<vmem>>, %arg4: memref<2x32xbf16, #tpu.memory_space<vmem>>, %arg5: memref<1x64xf32, #tpu.memory_space<vmem>>, %arg6: memref<1x32xf32, #tpu.memory_space<vmem>>, %arg7: memref<2x1xf32, #tpu.memory_space<vmem>>, %arg8: memref<3x128xf32, #tpu.memory_space<vmem>>) attributes {dimension_semantics = [#tpu.dimension_semantics<parallel>], iteration_bounds = array<i64: 3>, scalar_prefetch = 0 : i64, scratch_operands = 0 : i64, tpu.core_type = #tpu.core_type<tc>, window_params = [{transform_indices = @transform_0, window_bounds = array<i64: 128, 64>}, {pipeline_mode = #tpu.pipeline_mode<synchronous>, transform_indices = @transform_1, window_bounds = array<i64: 64, 64>}, {pipeline_mode = #tpu.pipeline_mode<synchronous>, transform_indices = @transform_2, window_bounds = array<i64: 64, 32>}, {pipeline_mode = #tpu.pipeline_mode<synchronous>, transform_indices = @transform_3, window_bounds = array<i64: 2, 32>}, {pipeline_mode = #tpu.pipeline_mode<synchronous>, transform_indices = @transform_4, window_bounds = array<i64: 1, 64>}, {pipeline_mode = #tpu.pipeline_mode<synchronous>, transform_indices = @transform_5, window_bounds = array<i64: 1, 32>}, {pipeline_mode = #tpu.pipeline_mode<synchronous>, transform_indices = @transform_6, window_bounds = array<i64: 2, 1>}, {transform_indices = @transform_7, window_bounds = array<i64: 3, 128>}]} {
    %c0 = arith.constant 0 : index
    %c0_0 = arith.constant 0 : index
    %0 = vector.load %arg1[%c0, %c0_0] : memref<128x64xbf16, #tpu.memory_space<vmem>>, vector<128x64xbf16>
    %c0_1 = arith.constant 0 : index
    %c0_2 = arith.constant 0 : index
    %1 = vector.load %arg2[%c0_1, %c0_2] : memref<64x64xbf16, #tpu.memory_space<vmem>>, vector<64x64xbf16>
    %cst = arith.constant dense<0.000000e+00> : vector<128x64xf32>
    %2 = tpu.matmul %0, %1, %cst {dimension_numbers = #tpu.dot_dimension_numbers<[1], [0], [0], [1], [0, 0, 1, 1], [], []>} : vector<128x64xbf16>, vector<64x64xbf16>, vector<128x64xf32> -> vector<128x64xf32>
    %c0_3 = arith.constant 0 : index
    %c0_4 = arith.constant 0 : index
    %3 = vector.load %arg5[%c0_3, %c0_4] : memref<1x64xf32, #tpu.memory_space<vmem>>, vector<1x64xf32>
    %4 = vector.broadcast %3 : vector<1x64xf32> to vector<128x64xf32>
    %5 = arith.addf %2, %4 : vector<128x64xf32>
    %cst_5 = arith.constant 0.000000e+00 : f32
    %6 = vector.broadcast %cst_5 : f32 to vector<128x64xf32>
    %7 = arith.maximumf %5, %6 : vector<128x64xf32>
    %8 = arith.truncf %7 : vector<128x64xf32> to vector<128x64xbf16>
    %c0_6 = arith.constant 0 : index
    %c0_7 = arith.constant 0 : index
    %9 = vector.load %arg3[%c0_6, %c0_7] : memref<64x32xbf16, #tpu.memory_space<vmem>>, vector<64x32xbf16>
    %cst_8 = arith.constant dense<0.000000e+00> : vector<128x32xf32>
    %10 = tpu.matmul %8, %9, %cst_8 {dimension_numbers = #tpu.dot_dimension_numbers<[1], [0], [0], [1], [0, 0, 1, 1], [], []>} : vector<128x64xbf16>, vector<64x32xbf16>, vector<128x32xf32> -> vector<128x32xf32>
    %c0_9 = arith.constant 0 : index
    %c0_10 = arith.constant 0 : index
    %11 = vector.load %arg6[%c0_9, %c0_10] : memref<1x32xf32, #tpu.memory_space<vmem>>, vector<1x32xf32>
    %12 = vector.broadcast %11 : vector<1x32xf32> to vector<128x32xf32>
    %13 = arith.addf %10, %12 : vector<128x32xf32>
    %cst_11 = arith.constant 0.000000e+00 : f32
    %14 = vector.broadcast %cst_11 : f32 to vector<128x32xf32>
    %15 = arith.maximumf %13, %14 : vector<128x32xf32>
    %c0_12 = arith.constant 0 : index
    %c0_13 = arith.constant 0 : index
    %16 = vector.load %arg4[%c0_12, %c0_13] : memref<2x32xbf16, #tpu.memory_space<vmem>>, vector<2x32xbf16>
    %17 = arith.truncf %15 : vector<128x32xf32> to vector<128x32xbf16>
    %cst_14 = arith.constant dense<0.000000e+00> : vector<2x128xf32>
    %18 = tpu.matmul %16, %17, %cst_14 {dimension_numbers = #tpu.dot_dimension_numbers<[1], [1], [0], [0], [0, 0, 1, 0], [], []>} : vector<2x32xbf16>, vector<128x32xbf16>, vector<2x128xf32> -> vector<2x128xf32>
    %c0_15 = arith.constant 0 : index
    %c0_16 = arith.constant 0 : index
    %19 = vector.load %arg7[%c0_15, %c0_16] : memref<2x1xf32, #tpu.memory_space<vmem>>, vector<2x1xf32>
    %20 = vector.broadcast %19 : vector<2x1xf32> to vector<2x128xf32>
    %21 = arith.addf %18, %20 : vector<2x128xf32>
    %cst_17 = arith.constant 0.000000e+00 : f32
    %22 = vector.broadcast %cst_17 : f32 to vector<2x128xf32>
    %23 = arith.subf %22, %21 : vector<2x128xf32>
    %24 = math.exp %23 : vector<2x128xf32>
    %cst_18 = arith.constant 1.000000e+00 : f32
    %25 = vector.broadcast %cst_18 : f32 to vector<2x128xf32>
    %26 = arith.addf %25, %24 : vector<2x128xf32>
    %27 = tpu.reciprocal %26 : vector<2x128xf32> -> vector<2x128xf32>
    %28 = vector.extract_strided_slice %27 {offsets = [0, 0], sizes = [1, 128], strides = [1, 1]} : vector<2x128xf32> to vector<1x128xf32>
    %29 = vector.extract_strided_slice %27 {offsets = [1, 0], sizes = [1, 128], strides = [1, 1]} : vector<2x128xf32> to vector<1x128xf32>
    %30 = arith.mulf %28, %29 : vector<1x128xf32>
    %31 = tpu.concatenate %28, %29, %30 in 0 : vector<1x128xf32>, vector<1x128xf32>, vector<1x128xf32> -> vector<3x128xf32>
    %c0_19 = arith.constant 0 : index
    %c0_20 = arith.constant 0 : index
    %32 = vector.load %arg8[%c0_19, %c0_20] : memref<3x128xf32, #tpu.memory_space<vmem>>, vector<3x128xf32>
    tpu.vector_store %arg8[%c0_19, %c0_20], %31 {strides = array<i32>} : memref<3x128xf32, #tpu.memory_space<vmem>>, vector<3x128xf32>,
    return
  }
  func.func @transform_0(%arg0: i32) -> (i32, i32) {
    %c0_i32 = arith.constant 0 : i32
    %c0_i32_0 = arith.constant 0 : i32
    return %arg0, %c0_i32 : i32, i32
  }
  func.func @transform_1(%arg0: i32) -> (i32, i32) {
    %c0_i32 = arith.constant 0 : i32
    %c0_i32_0 = arith.constant 0 : i32
    %c0_i32_1 = arith.constant 0 : i32
    return %c0_i32, %c0_i32_0 : i32, i32
  }
  func.func @transform_2(%arg0: i32) -> (i32, i32) {
    %c0_i32 = arith.constant 0 : i32
    %c0_i32_0 = arith.constant 0 : i32
    %c0_i32_1 = arith.constant 0 : i32
    return %c0_i32, %c0_i32_0 : i32, i32
  }
  func.func @transform_3(%arg0: i32) -> (i32, i32) {
    %c0_i32 = arith.constant 0 : i32
    %c0_i32_0 = arith.constant 0 : i32
    %c0_i32_1 = arith.constant 0 : i32
    return %c0_i32, %c0_i32_0 : i32, i32
  }
  func.func @transform_4(%arg0: i32) -> (i32, i32) {
    %c0_i32 = arith.constant 0 : i32
    %c0_i32_0 = arith.constant 0 : i32
    %c0_i32_1 = arith.constant 0 : i32
    return %c0_i32, %c0_i32_0 : i32, i32
  }
  func.func @transform_5(%arg0: i32) -> (i32, i32) {
    %c0_i32 = arith.constant 0 : i32
    %c0_i32_0 = arith.constant 0 : i32
    %c0_i32_1 = arith.constant 0 : i32
    return %c0_i32, %c0_i32_0 : i32, i32
  }
  func.func @transform_6(%arg0: i32) -> (i32, i32) {
    %c0_i32 = arith.constant 0 : i32
    %c0_i32_0 = arith.constant 0 : i32
    %c0_i32_1 = arith.constant 0 : i32
    return %c0_i32, %c0_i32_0 : i32, i32
  }
  func.func @transform_7(%arg0: i32) -> (i32, i32) {
    %c0_i32 = arith.constant 0 : i32
    %c0_i32_0 = arith.constant 0 : i32
    return %c0_i32, %arg0 : i32, i32
  }
}

</mosaic_0001>

<bundles_post_ra>
// kernel: tpu_custom_call.1
= control target key start
LH: loop header
LB: loop body
LE: loop exit
PB: predicated region body
PF: predicated region fallthrough
CT: control target
= control target key end

     0   :  { %12 = vsyncpa [#allocation3], 0  ;;  %s1385_s0 = inlined_call_operand.vmem [shape: bf16[320,64], index: 0, kind: input, shape index: {}]   ;;  %s1386_s1 = inlined_call_operand.vmem [shape: bf16[64,64], index: 1, kind: input, shape index: {}]   ;;  %s1387_s2 = inlined_call_operand.vmem [shape: bf16[64,32], index: 2, kind: input, shape index: {}]   ;;  %s1388_s3 = inlined_call_operand.vmem [shape: bf16[2,32], index: 3, kind: input, shape index: {}]   ;;  %s1389_s4 = inlined_call_operand.vmem [shape: f32[1,64], index: 4, kind: input, shape index: {}]   ;;  %s1390_s5 = inlined_call_operand.vmem [shape: f32[1,32], index: 5, kind: input, shape index: {}]   ;;  %s1391_s6 = inlined_call_operand.vmem [shape: f32[2,1], index: 6, kind: input, shape index: {}]   ;;  %s1392_s7 = inlined_call_operand.hbm [shape: f32[3,320], index: 7, kind: output, shape index: {}]  }
   0x1   :  { %14 = vsyncpa [#allocation3 + $0x1], 0  ;;  %s1206_s24 = smov 0   ;;  %s1208_s25 = smov 0  }
   0x2   :  { %s1210_s26 = smov 0   ;;  %s1212_s27 = smov 0  }
   0x3 LB: > { %s1227_s28 = sadd.s32 4294967295, %s1160_s27   ;;  %s888_s29 = sadd.s32 4294967294, %s1160_s27   ;;  %s1160_s27 = sphi %s1212_s27, %s1398_s27   ;;  %s1156_s26 = sphi %s1210_s26, %s1397_s26   ;;  %s1152_s25 = sphi %s1208_s25, %s1396_s25   ;;  %s1148_s24 = sphi %s1206_s24, %s1395_s24  }
   0x4   : > { %s1231_s30 = sadd.s32 1, %s1160_s27   ;;  %s179_s8 = sadd.s32 1, %s1156_s26 }
   0x5   : > { %s176_s9 = ssub.s32 %s1160_s27, %s1231_s30  ;;  %p189_p0 = scmp.ne.s32.totalorder %s1156_s26, %s1152_s25 }
   0x6   : > { %p177_p1 = scmp.eq.s32.totalorder %s176_s9, 0  ;;  %p190_p2 = scmp.eq.s32.totalorder %s1227_s28, 2 }
   0x7   : > { %p195_p3 = scmp.ne.s32.totalorder %s1152_s25, %s1148_s24  ;;  %p196_p4 = scmp.eq.s32.totalorder %s888_s29, 2 }
   0x8   : > { %s1242_s10 = scalar_select %p177_p1, %s1156_s26, %s179_s8  }
   0x9   : > { %p1244_p5 = por %p190_p2, %p189_p0  ;;  %p1248_p6 = por %p196_p4, %p195_p3 }
   0xa   : > { %p891_p7 = scmp.ge.s32.totalorder %s1160_s27, 1  ;;  %p249_p8 = scmp.lt.s32.totalorder %s1160_s27, 4 }
   0xc   : > { %p250_p9 = pnand %p891_p7, %p249_p8 }
   0xd   : > { %v1078_v0 = vld [vmem:[%s1386_s1] sm:$0xff] (!%p250_p9)   ;;  %s893_s15 = sshll.u32 (!%p250_p9), %s1227_s28, 4  ;;  %v1079_v1 = vld [vmem:[%s1386_s1 + $0x8] sm:$0xff] (!%p250_p9)   ;;  %v1080_v2 = vld [vmem:[%s1386_s1 + $0x10] sm:$0xff] (!%p250_p9)   ;;  %vm395_vm0 = vcmask (!%p250_p9), 523264   ;;  %vm1163_vm1 = vmmov (!%p250_p9), 0  }
   0xe   : > { %253 = sbr.rel (%p250_p9) target bundleno = 800 (0x320), region = 48  ;;  %p290_p10 = scmp.lt.s32.totalorder (!%p250_p9), %s893_s15, 39  ;;  %967 = vmatprep.subr.bf16.mxu1 (!%p250_p9), %v1078_v0  ;;  %v1081_v4 = vld [vmem:[%s1386_s1 + $0x18] sm:$0xff] (!%p250_p9)   ;;  %v1090_v5 = vld [vmem:[%s1387_s2] sm:$0xff] (!%p250_p9)   ;;  %v1091_v8 = vld [vmem:[%s1387_s2 + $0x8] sm:$0xff] (!%p250_p9)   ;;  %vm732_vm2 = vcmask (!%p250_p9), 261120  }
   0xf   : > { %968 = vmatpush3.bf16.msra.mxu1 (!%p250_p9), %v1078_v0  ;;  %v1092_v9 = vld [vmem:[%s1387_s2 + $0x10] sm:$0xff] (!%p250_p9)   ;;  %v1093_v15 = vld [vmem:[%s1387_s2 + $0x18] sm:$0xff] (!%p250_p9)   ;;  %v895_v16 = vld [vmem:[%s1389_s4] ss:$0 sm:$0xff] (!%p250_p9)  ;;  %s282_s14 = sand.u32 (!%p250_p9), 1, %s1152_s25   ;;  %s931_s16 = sshll.u32 (!%p250_p9), %s1227_s28, 6 }
  0x10   : > { %969 = vmatprep.subr.bf16.mxu1 (!%p250_p9), %v1079_v1  ;;  %vm812_vm3 = vcmask (!%p250_p9), 1041408   ;;  %s1343_s21 = scalar_lea.hbm (!%p250_p9), %s1392_s7, %s931_s16  ;;  %s816_s22 = scalar_lea.sflag (!%p250_p9), [#allocation3], %s282_s14 }
  0x11   : > { %s1165_s28 = smov (!%p250_p9), [#allocation2]  }
  0x12   : > { %s1102_s29 = sshll.u32 (!%p250_p9), %s1165_s28, 4  ;;  %s1103_s29 = int_to_ptr.vmem [resolvable:$false] %s1102_s29 }
  0x13   : > { %970 = vmatpush3.bf16.msra.mxu1 (!%p250_p9), %v1079_v1  ;;  %s1104_s8 = scalar_lea.vmem (!%p250_p9), %s1103_s29, 128 }
  0x14   : > { %971 = vmatprep.subr.bf16.mxu1 (!%p250_p9), %v1080_v2 }
  0x15   : > { %s1400_s15 = smov (!%p290_p10, %s893_s15), 39 }
  0x16   : > { %s894_s20 = sshll.u32 %s1400_s15, 2  ;;  %s892_s15 = sshll.u32 %s282_s14, 2 }
  0x17   : > { %s1267_s23 = scalar_lea.vmem %s1385_s0, %s894_s20  ;;  %972 = vmatpush3.bf16.msra.mxu1 %v1080_v2  ;;  %s284_s17 = scalar_lea.vmem [#allocation2], %s892_s15 }
  0x18   : > { %v1082_v3 = vld [vmem:[%s1267_s23] sm:$0xff]   ;;  %973 = vmatprep.subr.bf16.mxu1 %v1081_v4  ;;  %v1083_v6 = vld [vmem:[%s1267_s23 + $0x8] sm:$0xff]   ;;  %v1084_v7 = vld [vmem:[%s1267_s23 + $0x10] sm:$0xff]   ;;  %s829_s18 = sshll.u32 %s284_s17, 4  ;;  %s1345_s18 = int_to_ptr.vmem [resolvable:$true] %s829_s18 }
  0x19   : > { %975 = vmatprep.mubr.msk.bf16.mxu1 %vm395_vm0, %v1082_v3  ;;  %v1085_v10 = vld [vmem:[%s1267_s23 + $0x18] sm:$0xff]   ;;  %v1086_v11 = vld [vmem:[%s1267_s23 + $0x20] sm:$0xff]   ;;  %v1087_v12 = vld [vmem:[%s1267_s23 + $0x28] sm:$0xff]   ;;  %p1105_p0 = scmp.lt.s32.totalorder %s1345_s18, %s1103_s29 }
  0x1a   : > { %v1088_v13 = vld [vmem:[%s1267_s23 + $0x30] sm:$0xff]   ;;  %v1089_v14 = vld [vmem:[%s1267_s23 + $0x38] sm:$0xff]   ;;  %s1098_s23 = scalar_lea.vmem %s1345_s18, 64 }
  0x1b   : > { %974 = vmatpush3.bf16.msra.mxu1 %v1081_v4  ;;  %p1099_p11 = scmp.ne.s32.totalorder %s1345_s18, %s1098_s23  ;;  %p1106_p1 = scmp.lt.s32.totalorder %s1104_s8, %s1098_s23 }
  0x1c   : > { %991 = vmatprep.subr.bf16.mxu1 %v1090_v5 }
  0x1d   : > { %p1100_p12 = pnand %p1099_p11, %p1244_p5  ;;  %p1107_p2 = por %p1106_p1, %p1105_p0 }
  0x1e   : > { %976 = vmatmul.mubr.msk.bf16.vlgmr.msra.gmra.mrb[0].mxu1 %vm395_vm0, %v1083_v6 }
  0x1f   : > { %979 = vmatprep.mubr.msk.bf16.mxu1 %vm395_vm0, %v1084_v7  ;;  %992 = vmatpush3.bf16.msra.mxu1 %v1090_v5  ;;  %p1101_p13 = pneg %p1100_p12 }
  0x20   : > { %993 = vmatprep.subr.bf16.mxu1 %v1091_v8 }
  0x21   : > { %p1108_p3 = pnand %p1107_p2, %p1101_p13 }
  0x23   : > { %994 = vmatpush3.bf16.msra.mxu1 %v1091_v8 }
  0x24   : > { %995 = vmatprep.subr.bf16.mxu1 %v1092_v9 }
  0x26   : > { %980 = vmatmul.mubr.msk.bf16.gmra.mrb[4].mxu1 %vm395_vm0, %v1085_v10  ;;  %v726_v10 = vld [vmem:[%s1391_s6] sm:$0x3] }
  0x27   : > { %983 = vmatprep.mubr.msk.bf16.mxu1 %vm395_vm0, %v1086_v11  ;;  %996 = vmatpush3.bf16.msra.mxu1 %v1092_v9  ;;  %v1162_v9 = vmov 0.0   ;;  %v1164_v11 = vmov 0  }
  0x28   : > { %997 = vmatprep.subr.bf16.mxu1 %v1093_v15  ;;  %1015 = vmatprep.subr.bf16.mxu0 %v1162_v9 }
  0x29   : > { %1031 = vmatprep.mubr.msk.bf16.mxu0 %vm1163_vm1, %v1162_v9  ;;  %1077 = vset.pattern.permute.xlu0 %v1164_v11 }
  0x2a   : > { %729 = vperm.xlu0 %1077, %v726_v10  }
  0x2b   : > { %998 = vmatpush3.bf16.msra.mxu1 %v1093_v15 }
  0x2e   : > { %984 = vmatmul.mubr.msk.bf16.gmra.mrb[8].mxu1 %vm395_vm0, %v1087_v12  ;;  %v916_v12 = vld [vmem:[%s1390_s5] ss:$0 sm:$0xff] }
  0x2f   : > { %987 = vmatprep.mubr.msk.bf16.mxu1 %vm395_vm0, %v1088_v13 }
  0x36   : > { %988 = vmatmul.mubr.msk.bf16.gmra.mrb[12].mxu1 %vm395_vm0, %v1089_v14 }
  0xf1   : > { %v977_v17 = vpop.f32.mrb[0].mxu1 }
  0xf2   : > { %v463_v18 = vadd.f32 %v977_v17, %v895_v16  ;;  %v454_v19 = vpop.f32.mrb[1].mxu1 }
  0xf3   : > { %v455_v20 = vadd.f32 %v895_v16, %v454_v19  ;;  %v978_v21 = vpop.f32.mrb[2].mxu1 }
  0xf4   : > { %v466_v22 = vadd.f32 %v978_v21, %v895_v16  ;;  %v457_v23 = vpop.f32.mrb[3].mxu1  ;;  %v519_v25 = vmax.f32 %v463_v18, 0.0 }
  0xf5   : > { %v458_v24 = vadd.f32 %v895_v16, %v457_v23  ;;  %v517_v27 = vmax.f32 %v455_v20, 0.0 }
  0xf6   : > { %v520_v26 = vmax.f32 %v466_v22, 0.0 }
  0xf7   : > { %v518_v28 = vmax.f32 %v458_v24, 0.0 }
  0xf8   : > { %v534_v29 = vpack.c.bf16 %v520_v26, %v519_v25 }
  0xf9   : > { %v533_v30 = vpack.c.bf16 %v518_v28, %v517_v27  ;;  %v981_v31 = vpop.f32.mrb[4].mxu1 }
  0xfa   : > { %v479_v32 = vadd.f32 %v981_v31, %v895_v16  ;;  %v470_v33 = vpop.f32.mrb[5].mxu1 }
  0xfb   : > { %v471_v34 = vadd.f32 %v895_v16, %v470_v33  ;;  %999 = vmatprep.mubr.msk.bf16.mxu1 %vm395_vm0, %v533_v30  ;;  %v982_v35 = vpop.f32.mrb[6].mxu1 }
  0xfc   : > { %v523_v36 = vmax.f32 %v479_v32, 0.0  ;;  %v482_v37 = vadd.f32 %v982_v35, %v895_v16  ;;  %1000 = vmatmul.mubr.msk.bf16.vlgmr.msra.gmra.mrb[16].mxu1 %vm395_vm0, %v534_v29  ;;  %v473_v38 = vpop.f32.mrb[7].mxu1 }
  0xfd   : > { %v521_v39 = vmax.f32 %v471_v34, 0.0  ;;  %v474_v40 = vadd.f32 %v895_v16, %v473_v38 }
  0xfe   : > { %v524_v41 = vmax.f32 %v482_v37, 0.0 }
  0xff   : > { %v522_v42 = vmax.f32 %v474_v40, 0.0 }
 0x100   : > { %v536_v43 = vpack.c.bf16 %v524_v41, %v523_v36 }
 0x101   : > { %v535_v44 = vpack.c.bf16 %v522_v42, %v521_v39  ;;  %v985_v45 = vpop.f32.mrb[8].mxu1 }
 0x102   : > { %v495_v46 = vadd.f32 %v985_v45, %v895_v16  ;;  %v486_v47 = vpop.f32.mrb[9].mxu1 }
 0x103   : > { %1003 = vmatprep.mubr.msk.bf16.mxu1 %vm395_vm0, %v535_v44  ;;  %v487_v48 = vadd.f32 %v895_v16, %v486_v47  ;;  %v986_v49 = vpop.f32.mrb[10].mxu1 }
 0x104   : > { %1004 = vmatmul.mubr.msk.bf16.gmra.mrb[20].mxu1 %vm395_vm0, %v536_v43  ;;  %v527_v50 = vmax.f32 %v495_v46, 0.0  ;;  %v498_v51 = vadd.f32 %v986_v49, %v895_v16  ;;  %v489_v52 = vpop.f32.mrb[11].mxu1 }
 0x105   : > { %v525_v53 = vmax.f32 %v487_v48, 0.0  ;;  %v490_v54 = vadd.f32 %v895_v16, %v489_v52 }
 0x106   : > { %v528_v55 = vmax.f32 %v498_v51, 0.0 }
 0x107   : > { %v526_v56 = vmax.f32 %v490_v54, 0.0 }
 0x108   : > { %v538_v57 = vpack.c.bf16 %v528_v55, %v527_v50 }
 0x109   : > { %v537_v58 = vpack.c.bf16 %v526_v56, %v525_v53  ;;  %v989_v59 = vpop.f32.mrb[12].mxu1 }
 0x10a   : > { %v511_v60 = vadd.f32 %v989_v59, %v895_v16  ;;  %v502_v61 = vpop.f32.mrb[13].mxu1 }
 0x10b   : > { %1007 = vmatprep.mubr.msk.bf16.mxu1 %vm395_vm0, %v537_v58  ;;  %v503_v62 = vadd.f32 %v895_v16, %v502_v61  ;;  %v990_v63 = vpop.f32.mrb[14].mxu1 }
 0x10c   : > { %1008 = vmatmul.mubr.msk.bf16.gmra.mrb[24].mxu1 %vm395_vm0, %v538_v57  ;;  %v531_v0 = vmax.f32 %v511_v60, 0.0  ;;  %v514_v1 = vadd.f32 %v990_v63, %v895_v16  ;;  %v505_v2 = vpop.f32.mrb[15].mxu1 }
 0x10d   : > { %v529_v3 = vmax.f32 %v503_v62, 0.0  ;;  %v506_v4 = vadd.f32 %v895_v16, %v505_v2 }
 0x10e   : > { %v532_v5 = vmax.f32 %v514_v1, 0.0 }
 0x10f   : > { %v530_v6 = vmax.f32 %v506_v4, 0.0 }
 0x110   : > { %v540_v7 = vpack.c.bf16 %v532_v5, %v531_v0 }
 0x111   : > { %v539_v8 = vpack.c.bf16 %v530_v6, %v529_v3 }
 0x113   : > { %1011 = vmatprep.mubr.msk.bf16.mxu1 %vm395_vm0, %v539_v8 }
 0x114   : > { %1012 = vmatmul.mubr.msk.bf16.gmra.mrb[28].mxu1 %vm395_vm0, %v540_v7 }
 0x1cf   : > { %v1001_v13 = vpop.f32.mrb[16].mxu1 }
 0x1d0   : > { %v647_v14 = vadd.f32 %v1001_v13, %v916_v12  ;;  %v638_v15 = vpop.f32.mrb[17].mxu1 }
 0x1d1   : > { %v639_v16 = vadd.f32 %v916_v12, %v638_v15  ;;  %v1002_v17 = vpop.f32.mrb[18].mxu1  ;;  %v730_v15 = vpop.permute.xlu0 %729 }
 0x1d2   : > { %v650_v18 = vadd.f32 %v1002_v17, %v916_v12  ;;  %v641_v19 = vpop.f32.mrb[19].mxu1  ;;  %v703_v21 = vmax.f32 %v647_v14, 0.0  ;;  %v717_v14 = vld [vmem:[%s1388_s3] sm:$0x1] }
 0x1d3   : > { %v642_v20 = vadd.f32 %v916_v12, %v641_v19  ;;  %v701_v23 = vmax.f32 %v639_v16, 0.0 }
 0x1d4   : > { %v704_v22 = vmax.f32 %v650_v18, 0.0 }
 0x1d5   : > { %v702_v24 = vmax.f32 %v642_v20, 0.0 }
 0x1d6   : > { %v719_v25 = vpack.c.bf16 %v704_v22, %v703_v21 }
 0x1d7   : > { %v1005_v26 = vpop.f32.mrb[20].mxu1  ;;  %v718_v27 = vpack.c.bf16 %v702_v24, %v701_v23 }
 0x1d8   : > { %v663_v28 = vadd.f32 %v1005_v26, %v916_v12  ;;  %v654_v29 = vpop.f32.mrb[21].mxu1  ;;  %v740_v45 = vsel %vm732_vm2, %v719_v25, 0 }
 0x1d9   : > { %v655_v30 = vadd.f32 %v916_v12, %v654_v29  ;;  %v1006_v31 = vpop.f32.mrb[22].mxu1  ;;  %v737_v32 = vsel %vm732_vm2, %v718_v27, 0 }
 0x1da   : > { %v707_v33 = vmax.f32 %v663_v28, 0.0  ;;  %v666_v34 = vadd.f32 %v1006_v31, %v916_v12  ;;  %1016 = vmatpush3.bf16.xpose.msra.mxu0 %v737_v32  ;;  %v657_v35 = vpop.f32.mrb[23].mxu1 }
 0x1db   : > { %v705_v36 = vmax.f32 %v655_v30, 0.0  ;;  %v658_v37 = vadd.f32 %v916_v12, %v657_v35  ;;  %1017 = vmatprep.subr.bf16.mxu0 %v1162_v9 }
 0x1dc   : > { %v708_v38 = vmax.f32 %v666_v34, 0.0 }
 0x1dd   : > { %v706_v39 = vmax.f32 %v658_v37, 0.0 }
 0x1de   : > { %v721_v40 = vpack.c.bf16 %v708_v38, %v707_v33 }
 0x1df   : > { %v720_v41 = vpack.c.bf16 %v706_v39, %v705_v36  ;;  %v1009_v42 = vpop.f32.mrb[24].mxu1 }
 0x1e0   : > { %v679_v43 = vadd.f32 %v1009_v42, %v916_v12  ;;  %v670_v44 = vpop.f32.mrb[25].mxu1  ;;  %v746_v8 = vsel %vm732_vm2, %v721_v40, 0 }
 0x1e1   : > { %v671_v46 = vadd.f32 %v916_v12, %v670_v44  ;;  %v1010_v47 = vpop.f32.mrb[26].mxu1  ;;  %v743_v60 = vsel %vm732_vm2, %v720_v41, 0 }
 0x1e2   : > { %1018 = vmatpush3.bf16.xpose.msra.mxu0 %v740_v45  ;;  %v711_v48 = vmax.f32 %v679_v43, 0.0  ;;  %v682_v49 = vadd.f32 %v1010_v47, %v916_v12  ;;  %v673_v50 = vpop.f32.mrb[27].mxu1 }
 0x1e3   : > { %v709_v51 = vmax.f32 %v671_v46, 0.0  ;;  %1019 = vmatprep.subr.bf16.mxu0 %v1162_v9  ;;  %v674_v52 = vadd.f32 %v916_v12, %v673_v50 }
 0x1e4   : > { %v712_v53 = vmax.f32 %v682_v49, 0.0 }
 0x1e5   : > { %v710_v54 = vmax.f32 %v674_v52, 0.0 }
 0x1e6   : > { %v723_v55 = vpack.c.bf16 %v712_v53, %v711_v48 }
 0x1e7   : > { %v722_v56 = vpack.c.bf16 %v710_v54, %v709_v51  ;;  %v1013_v57 = vpop.f32.mrb[28].mxu1 }
 0x1e8   : > { %v695_v58 = vadd.f32 %v1013_v57, %v916_v12  ;;  %v686_v59 = vpop.f32.mrb[29].mxu1  ;;  %v752_v11 = vsel %vm732_vm2, %v723_v55, 0 }
 0x1e9   : > { %v687_v61 = vadd.f32 %v916_v12, %v686_v59  ;;  %v1014_v62 = vpop.f32.mrb[30].mxu1  ;;  %v749_v10 = vsel %vm732_vm2, %v722_v56, 0 }
 0x1ea   : > { %1020 = vmatpush3.bf16.xpose.msra.mxu0 %v743_v60  ;;  %v715_v63 = vmax.f32 %v695_v58, 0.0  ;;  %v698_v0 = vadd.f32 %v1014_v62, %v916_v12  ;;  %v689_v1 = vpop.f32.mrb[31].mxu1 }
 0x1eb   : > { %1021 = vmatprep.subr.bf16.mxu0 %v1162_v9  ;;  %v713_v2 = vmax.f32 %v687_v61, 0.0  ;;  %v690_v3 = vadd.f32 %v916_v12, %v689_v1 }
 0x1ec   : > { %v716_v4 = vmax.f32 %v698_v0, 0.0 }
 0x1ed   : > { %v714_v5 = vmax.f32 %v690_v3, 0.0 }
 0x1ee   : > { %v725_v6 = vpack.c.bf16 %v716_v4, %v715_v63 }
 0x1ef   : > { %v724_v7 = vpack.c.bf16 %v714_v5, %v713_v2 }
 0x1f0   : > { %v758_v13 = vsel %vm732_vm2, %v725_v6, 0 }
 0x1f1   : > { %v755_v12 = vsel %vm732_vm2, %v724_v7, 0 }
 0x1f2   : > { %1022 = vmatpush3.bf16.xpose.msra.mxu0 %v746_v8 }
 0x1f3   : > { %1023 = vmatprep.subr.bf16.mxu0 %v1162_v9 }
 0x1fa   : > { %1024 = vmatpush3.bf16.xpose.msra.mxu0 %v749_v10 }
 0x1fb   : > { %1025 = vmatprep.subr.bf16.mxu0 %v1162_v9 }
 0x202   : > { %1026 = vmatpush3.bf16.xpose.msra.mxu0 %v752_v11 }
 0x203   : > { %1027 = vmatprep.subr.bf16.mxu0 %v1162_v9 }
 0x20a   : > { %1028 = vmatpush3.bf16.xpose.msra.mxu0 %v755_v12 }
 0x20b   : > { %1029 = vmatprep.subr.bf16.mxu0 %v1162_v9 }
 0x212   : > { %1030 = vmatpush3.bf16.xpose.msra.mxu0 %v758_v13 }
 0x219   : > { %1032 = vmatmul.mubr.msk.bf16.vlgmr.msra.gmra.mrb[0].mxu0 %vm732_vm2, %v717_v14 }
 0x2ec   : > { %v794_v16 = vpop.f32.mrb[0].mxu0 }
 0x2ed   : > { %v795_v17 = vadd.f32 %v794_v16, %v730_v15  ;;  %v1033_v18 = vpop.f32.mrb[1].mxu0 }
 0x2ee   : > { %v797_v19 = vpop.f32.mrb[2].mxu0 }
 0x2ef   : > { %v800_v20 = vsub.f32 0.0, %v795_v17  ;;  %v1034_v21 = vpop.f32.mrb[3].mxu0 }
 0x2f1   : > { %v801_v22 = vmul.f32 1.442695, %v800_v20 }
 0x2f3   : > { %1094 = vpow2.f32 %v801_v22 }
 0x2fd   : > { %v1095_v9 = vpop.eup %1094 }
 0x2fe   : > { %v803_v23 = vadd.f32 1.0, %v1095_v9 }
 0x300   : > { %1096 = vrcp.f32 %v803_v23 }
 0x30a   : > { %v1097_v24 = vpop.eup %1096 }
 0x30b   : > { %v806_v25 = vrot.slane %v1097_v24, 1 }
 0x30d   : > { %v808_v26 = vmul.f32 %v1097_v24, %v806_v25 }
 0x30f   : > { %v810_v27 = vrot.slane %v808_v26, 6 }
 0x311   : > { %v813_v28 = vsel %vm812_vm3, %v1097_v24, %v810_v27 }
 0x312   : > { %814 = vst [vmem:[%s284_s17] sm:$0x7] %v813_v28 }
 0x313   : > { %1111 = shalt.err (!%p1108_p3)
}
 0x314   : > { %s1112_s9 = scalar_lea.hbm %s1343_s21, 64  ;;  %s1116_s15 = scalar_lea.hbm %s1392_s7, 192 }
 0x315   : > { %p1113_p4 = scmp.ne.s32.totalorder %s1343_s21, %s1112_s9  ;;  %p1117_p9 = scmp.lt.u32.totalorder %s1343_s21, %s1392_s7 }
 0x316   : > { %p1118_p10 = scmp.lt.u32.totalorder %s1116_s15, %s1112_s9  ;;  %p1120_p12 = scmp.lt.u32.totalorder %s1112_s9, %s1343_s21 }
 0x317   : > { %p1114_p7 = pnand %p1113_p4, %p1244_p5 }
 0x318   : > { %p1119_p11 = por %p1118_p10, %p1117_p9 }
 0x319   : > { %p1115_p8 = pneg %p1114_p7 }
 0x31a   : > { %p1121_p13 = por %p1120_p12, %p1119_p11 }
 0x31c   : > { %p1122_p0 = pnand %p1121_p13, %p1115_p8 }
 0x31e   : > { %1125 = shalt.err (!%p1122_p0)
}
 0x31f   : > { %1035 = dma.vmem_to_hbm [thread:$0]  (%p1244_p5), %s1345_s18, 64, %s1343_s21, %s816_s22  }
 0x320 PF: > { %p1041_p1 = scmp.ge.s32.totalorder %s1160_s27, 2  ;;  %s841_s19 = sand.u32 1, %s1148_s24  }
 0x321   : > { %s842_s20 = scalar_lea.sflag [#allocation3], %s841_s19 }
 0x322   : > { %p1038_p2 = pnand %p1041_p1, %p1248_p6 }
 0x324   : > { %1143 = dma.done.wait (!%p1038_p2), %s842_s20, 64  }
 0x325   : > { %1145 = vsyncadd (!%p1038_p2), %s842_s20, 4294967232  ;;  %p17_p3 = scmp.ge.s32.totalorder %s1231_s30, 5   ;;  %s1395_s24 = smov %s1152_s25 }
 0x326   : > { %s1396_s25 = smov %s1156_s26  ;;  %s1397_s26 = smov %s1242_s10 }
 0x327   : > { %s1398_s27 = smov %s1231_s30  ;;  %19 = sbr.rel (!%p17_p3) target bundleno = 3 (0x3), region = 83 }
 0x32e   :  { %847 = vsyncpa [#allocation3], 1 }
 0x32f   :  { %849 = vsyncpa [#allocation3 + $0x1], 1 }

</bundles_post_ra>
